<compile_context>
chip_gen: v7x
topology: tpu7x:2x2x1
jax: 0.10.0
libtpu: 0.0.40
codegen_flags: <defaults>
</compile_context>

<pallas_src>
import functools

import jax
import jax.numpy as jnp
from jax.experimental import pallas as pl
from jax.experimental.pallas import tpu as pltpu


def _round_up(v, m):
    return (v + m - 1) // m * m


def _conv_lrelu_kernel(x_ref, w_ref, b_ref, o_ref, lhs_ref, *, ksize, kc, kcp, neg_slope):
    # x_ref  : (NB*Hp, KC)         f32   one batch block, rows = (image, padded row)
    # w_ref  : (ksize*KCp, Npad)   bf16  banded weight, kh folded onto the contraction axis
    # b_ref  : (1, Npad)           f32   bias, lane-dense (w-major, cout-minor), zero padded
    # o_ref  : (NB*Hp, Npad)       f32   lane-dense output (junk rows h>=Ho sliced wrapper-side)
    # lhs_ref: (NB*Hp, ksize*KCp)  bf16  VMEM scratch: staged, kh-folded LHS
    m_rows = x_ref.shape[0]
    m_eff = m_rows - (ksize - 1)          # rows whose full 3-tap window is in range

    # Zero once so the lane-pad columns (KC..KCp of each slab) and the tail rows contribute
    # exact zeros to the matmul (guards against stale-VMEM NaNs leaking through zero weights).
    lhs_ref[...] = jnp.zeros_like(lhs_ref)

    # Stage the three row-shifted (kh) copies side by side on the lane axis; destination lane
    # offsets are multiples of 128 (aligned stores); the f32 -> bf16 cast happens here.
    for kh in range(ksize):               # static, unrolled
        lhs_ref[pl.ds(0, m_eff), pl.ds(kh * kcp, kc)] = (
            x_ref[pl.ds(kh, m_eff), :].astype(lhs_ref.dtype))

    # Single MXU matmul: K = ksize*KCp (taps folded), N = Npad (lane-dense), f32 accumulate.
    acc = jnp.dot(lhs_ref[...], w_ref[...], preferred_element_type=jnp.float32)
    acc = acc + b_ref[...]                           # (1, Npad) broadcasts over rows
    acc = jnp.where(acc > 0, acc, neg_slope * acc)   # LeakyReLU(0.01)
    o_ref[...] = acc.astype(o_ref.dtype)


def prepare_basic_block_params(weight, bias, h, w, *, ksize=3, padding=2):
    """Precompute the banded (kw- and kh-folded) weight + lane-dense bias.

    Run once per weight update (hoisted out of the per-call forward path per perf review).
    weight: (Cout, Cin, K, K) torch OIHW; bias: (Cout,).
    """
    cout, cin = weight.shape[0], weight.shape[1]
    hp, wp = h + 2 * padding, w + 2 * padding
    wo = wp - ksize + 1
    kc = wp * cin
    kcp = _round_up(kc, 128)            # per-tap slab width (aligned staging stores)
    npad = _round_up(wo * cout, 128)    # lane-dense output width

    # kw fold: band(kh)[wp*Cin+ci, w*Cout+co] = W[co, ci, kh, wp-w] for 0 <= wp-w < ksize.
    wt = jnp.transpose(weight, (2, 3, 1, 0)).astype(jnp.float32)   # (K, K, Cin, Cout)
    kw_idx = jnp.arange(wp)[:, None] - jnp.arange(wo)[None, :]     # (Wp, Wo)
    valid = (kw_idx >= 0) & (kw_idx < ksize)
    bm = wt[:, jnp.clip(kw_idx, 0, ksize - 1)]                     # (K, Wp, Wo, Cin, Cout)
    bm = jnp.where(valid[None, :, :, None, None], bm, 0.0)
    bm = jnp.transpose(bm, (0, 1, 3, 2, 4)).reshape(ksize, kc, wo * cout)

    # kh fold onto the contraction axis; zero-pad to the aligned slab / lane widths.
    wm = jnp.zeros((ksize, kcp, npad), jnp.float32)
    wm = wm.at[:, :kc, :wo * cout].set(bm)
    wm = wm.reshape(ksize * kcp, npad).astype(jnp.bfloat16)

    b_dense = jnp.zeros((1, npad), jnp.float32)
    b_dense = b_dense.at[0, :wo * cout].set(jnp.tile(bias.astype(jnp.float32), wo))
    return wm, b_dense


@functools.partial(jax.jit, static_argnames=("cout", "ksize", "padding", "neg_slope"))
def basic_block_forward(x_nchw, wm, b_dense, *, cout, ksize=3, padding=2, neg_slope=0.01):
    """x_nchw: (N, Cin, H, W); wm/b_dense from prepare_basic_block_params."""
    n, cin, h, w = x_nchw.shape
    hp, wp = h + 2 * padding, w + 2 * padding
    ho, wo = hp - ksize + 1, wp - ksize + 1
    kc = wp * cin
    kcp = _round_up(kc, 128)
    npad = _round_up(wo * cout, 128)
    assert wm.shape == (ksize * kcp, npad)

    # Batch blocking: whole batch per step for small N, blocks of 8 otherwise (amortizes the
    # ~0.35 us/step overhead and fills the MXU M axis); >1 step also lets the BlockSpec
    # pipeline prefetch the next x/out block.
    nb = min(n, 8)
    num_blocks = -(-n // nb)
    if num_blocks > 1 and (nb * hp) % 16 != 0:
        nb, num_blocks = n, 1            # keep multi-block row tiles sublane-aligned
    n_pad = nb * num_blocks

    # Layout plumbing in plain JAX (cheap): NCHW -> NHWC, zero-pad spatial + batch, then
    # flatten (image, padded row) onto the matmul M axis and (Wp, Cin) onto the lane axis.
    x_nhwc = jnp.transpose(x_nchw, (0, 2, 3, 1))
    x_p = jnp.pad(x_nhwc, ((0, n_pad - n), (padding, padding), (padding, padding), (0, 0)))
    x2d = x_p.reshape(n_pad * hp, kc).astype(jnp.float32)

    kernel = functools.partial(_conv_lrelu_kernel, ksize=ksize, kc=kc, kcp=kcp,
                               neg_slope=neg_slope)

    out2d = pl.pallas_call(
        kernel,
        out_shape=jax.ShapeDtypeStruct((n_pad * hp, npad), jnp.float32),
        grid_spec=pltpu.PrefetchScalarGridSpec(
            num_scalar_prefetch=0,
            grid=(num_blocks,),
            in_specs=[
                pl.BlockSpec((nb * hp, kc), lambda i: (i, 0)),
                # Grid-invariant weight / bias blocks (constant index map -> fetched once).
                pl.BlockSpec((ksize * kcp, npad), lambda i: (0, 0)),
                pl.BlockSpec((1, npad), lambda i: (0, 0)),
            ],
            out_specs=pl.BlockSpec((nb * hp, npad), lambda i: (i, 0)),
            scratch_shapes=[pltpu.VMEM((nb * hp, ksize * kcp), jnp.bfloat16)],
        ),
        compiler_params=pltpu.CompilerParams(
            dimension_semantics=("parallel",),
            vmem_limit_bytes=32 * 1024 * 1024,   # explicit (v5e scoped default is only 16 MiB)
        ),
    )(x2d, wm, b_dense)

    # Drop junk rows (h >= Ho per image), lane padding and batch padding; split the lane axis
    # back into (Wo, Cout) and return NCHW to match torch.
    out = out2d.reshape(n_pad, hp, npad)[:n, :ho, :wo * cout]
    out = out.reshape(n, ho, wo, cout)
    return jnp.transpose(out, (0, 3, 1, 2)).astype(x_nchw.dtype)


if __name__ == "__main__":
    key = jax.random.PRNGKey(0)
    k_x, k_w, k_b = jax.random.split(key, 3)

    N, Cin, H, W = 2, 4, 16, 16
    Cout, K, PAD = 8, 3, 2

    x = jax.random.normal(k_x, (N, Cin, H, W), dtype=jnp.float32)
    # Deterministic synthetic params (shapes match nn.Conv2d(Cin, Cout, (3,3), padding=2)).
    fan_in = Cin * K * K
    bound = 1.0 / (fan_in ** 0.5)
    weight = jax.random.uniform(k_w, (Cout, Cin, K, K), jnp.float32, -bound, bound)
    bias = jax.random.uniform(k_b, (Cout,), jnp.float32, -bound, bound)

    # Weight prep is hoisted: done once, reused across forward calls.
    wm, b_dense = prepare_basic_block_params(weight, bias, H, W, ksize=K, padding=PAD)

    out = basic_block_forward(x, wm, b_dense, cout=Cout, ksize=K, padding=PAD)
    out = jax.block_until_ready(out)

    # Reference: f32 conv + LeakyReLU on bf16-rounded operands (the kernel deliberately feeds
    # the MXU bf16 per the perf review; accumulation / bias / activation stay f32).
    x_bf = x.astype(jnp.bfloat16).astype(jnp.float32)
    w_bf = weight.astype(jnp.bfloat16).astype(jnp.float32)
    ref = jax.lax.conv_general_dilated(
        x_bf, w_bf, window_strides=(1, 1), padding=((PAD, PAD), (PAD, PAD)),
        dimension_numbers=("NCHW", "OIHW", "NCHW")) + bias[None, :, None, None]
    ref = jnp.where(ref > 0, ref, 0.01 * ref)

    Ho = H + 2 * PAD - K + 1
    assert out.shape == (N, Cout, Ho, Ho), out.shape
    assert jnp.allclose(out, ref, atol=2e-3, rtol=2e-3)

    print("KERNEL_OK")
</pallas_src>

<mosaic_0001>
module attributes {stable_mosaic.version = 11 : i64} {
  func.func @_conv_lrelu_kernel(%arg0: i32, %arg1: memref<40x80xf32, #tpu.memory_space<vmem>>, %arg2: memref<384x256xbf16, #tpu.memory_space<vmem>>, %arg3: memref<1x256xf32, #tpu.memory_space<vmem>>, %arg4: memref<40x256xf32, #tpu.memory_space<vmem>>, %arg5: memref<40x384xbf16, #tpu.memory_space<vmem>>) attributes {dimension_semantics = [#tpu.dimension_semantics<parallel>], iteration_bounds = array<i64: 1>, scalar_prefetch = 0 : i64, scratch_operands = 1 : i64, tpu.core_type = #tpu.core_type<tc>, window_params = [{transform_indices = @transform_0, window_bounds = array<i64: 40, 80>}, {pipeline_mode = #tpu.pipeline_mode<synchronous>, transform_indices = @transform_1, window_bounds = array<i64: 384, 256>}, {pipeline_mode = #tpu.pipeline_mode<synchronous>, transform_indices = @transform_2, window_bounds = array<i64: 1, 256>}, {transform_indices = @transform_3, window_bounds = array<i64: 40, 256>}]} {
    %cst = arith.constant 0.000000e+00 : bf16
    %0 = vector.broadcast %cst : bf16 to vector<40x384xbf16>
    %c0 = arith.constant 0 : index
    %c0_0 = arith.constant 0 : index
    %1 = vector.load %arg5[%c0, %c0_0] : memref<40x384xbf16, #tpu.memory_space<vmem>>, vector<40x384xbf16>
    tpu.vector_store %arg5[%c0, %c0_0], %0 {strides = array<i32>} : memref<40x384xbf16, #tpu.memory_space<vmem>>, vector<40x384xbf16>,
    %c0_1 = arith.constant 0 : index
    %c0_2 = arith.constant 0 : index
    %2 = vector.load %arg1[%c0_1, %c0_2] : memref<40x80xf32, #tpu.memory_space<vmem>>, vector<38x80xf32>
    %3 = arith.truncf %2 : vector<38x80xf32> to vector<38x80xbf16>
    %c0_3 = arith.constant 0 : index
    %c0_4 = arith.constant 0 : index
    %4 = vector.load %arg5[%c0_3, %c0_4] : memref<40x384xbf16, #tpu.memory_space<vmem>>, vector<38x80xbf16>
    tpu.vector_store %arg5[%c0_3, %c0_4], %3 {strides = array<i32>} : memref<40x384xbf16, #tpu.memory_space<vmem>>, vector<38x80xbf16>,
    %c1 = arith.constant 1 : index
    %c0_5 = arith.constant 0 : index
    %5 = vector.load %arg1[%c1, %c0_5] : memref<40x80xf32, #tpu.memory_space<vmem>>, vector<38x80xf32>
    %6 = arith.truncf %5 : vector<38x80xf32> to vector<38x80xbf16>
    %c0_6 = arith.constant 0 : index
    %c128 = arith.constant 128 : index
    %7 = vector.load %arg5[%c0_6, %c128] : memref<40x384xbf16, #tpu.memory_space<vmem>>, vector<38x80xbf16>
    tpu.vector_store %arg5[%c0_6, %c128], %6 {strides = array<i32>} : memref<40x384xbf16, #tpu.memory_space<vmem>>, vector<38x80xbf16>,
    %c2 = arith.constant 2 : index
    %c0_7 = arith.constant 0 : index
    %8 = vector.load %arg1[%c2, %c0_7] : memref<40x80xf32, #tpu.memory_space<vmem>>, vector<38x80xf32>
    %9 = arith.truncf %8 : vector<38x80xf32> to vector<38x80xbf16>
    %c0_8 = arith.constant 0 : index
    %c256 = arith.constant 256 : index
    %10 = vector.load %arg5[%c0_8, %c256] : memref<40x384xbf16, #tpu.memory_space<vmem>>, vector<38x80xbf16>
    tpu.vector_store %arg5[%c0_8, %c256], %9 {strides = array<i32>} : memref<40x384xbf16, #tpu.memory_space<vmem>>, vector<38x80xbf16>,
    %c0_9 = arith.constant 0 : index
    %c0_10 = arith.constant 0 : index
    %11 = vector.load %arg5[%c0_9, %c0_10] : memref<40x384xbf16, #tpu.memory_space<vmem>>, vector<40x384xbf16>
    %c0_11 = arith.constant 0 : index
    %c0_12 = arith.constant 0 : index
    %12 = vector.load %arg2[%c0_11, %c0_12] : memref<384x256xbf16, #tpu.memory_space<vmem>>, vector<384x256xbf16>
    %cst_13 = arith.constant dense<0.000000e+00> : vector<40x256xf32>
    %13 = tpu.matmul %11, %12, %cst_13 {dimension_numbers = #tpu.dot_dimension_numbers<[1], [0], [0], [1], [0, 0, 1, 1], [], []>} : vector<40x384xbf16>, vector<384x256xbf16>, vector<40x256xf32> -> vector<40x256xf32>
    %c0_14 = arith.constant 0 : index
    %c0_15 = arith.constant 0 : index
    %14 = vector.load %arg3[%c0_14, %c0_15] : memref<1x256xf32, #tpu.memory_space<vmem>>, vector<1x256xf32>
    %15 = vector.broadcast %14 : vector<1x256xf32> to vector<40x256xf32>
    %16 = arith.addf %13, %15 : vector<40x256xf32>
    %cst_16 = arith.constant 0.000000e+00 : f32
    %17 = vector.broadcast %cst_16 : f32 to vector<40x256xf32>
    %18 = arith.cmpf ogt, %16, %17 : vector<40x256xf32>
    %cst_17 = arith.constant 0.00999999977 : f32
    %19 = vector.broadcast %cst_17 : f32 to vector<40x256xf32>
    %20 = arith.mulf %19, %16 : vector<40x256xf32>
    %21 = arith.select %18, %16, %20 : vector<40x256xi1>, vector<40x256xf32>
    %c0_18 = arith.constant 0 : index
    %c0_19 = arith.constant 0 : index
    %22 = vector.load %arg4[%c0_18, %c0_19] : memref<40x256xf32, #tpu.memory_space<vmem>>, vector<40x256xf32>
    tpu.vector_store %arg4[%c0_18, %c0_19], %21 {strides = array<i32>} : memref<40x256xf32, #tpu.memory_space<vmem>>, vector<40x256xf32>,
    return
  }
  func.func @transform_0(%arg0: i32) -> (i32, i32) {
    %c0_i32 = arith.constant 0 : i32
    %c0_i32_0 = arith.constant 0 : i32
    return %arg0, %c0_i32 : i32, i32
  }
  func.func @transform_1(%arg0: i32) -> (i32, i32) {
    %c0_i32 = arith.constant 0 : i32
    %c0_i32_0 = arith.constant 0 : i32
    %c0_i32_1 = arith.constant 0 : i32
    return %c0_i32, %c0_i32_0 : i32, i32
  }
  func.func @transform_2(%arg0: i32) -> (i32, i32) {
    %c0_i32 = arith.constant 0 : i32
    %c0_i32_0 = arith.constant 0 : i32
    %c0_i32_1 = arith.constant 0 : i32
    return %c0_i32, %c0_i32_0 : i32, i32
  }
  func.func @transform_3(%arg0: i32) -> (i32, i32) {
    %c0_i32 = arith.constant 0 : i32
    %c0_i32_0 = arith.constant 0 : i32
    return %arg0, %c0_i32 : i32, i32
  }
}

</mosaic_0001>

<bundles_post_ra>
// kernel: basic_block_forward.1
= control target key start
LH: loop header
LB: loop body
LE: loop exit
PB: predicated region body
PF: predicated region fallthrough
CT: control target
= control target key end

     0   :  { %v828_v1 = vmov 0   ;;  %vm51_vm0 = vcmask 650240   ;;  %vm56_vm1 = vcmask 649216   ;;  %s1112_s1 = inlined_call_operand.vmem [shape: bf16[384,256], index: 1, kind: input, shape index: {}]   ;;  %s1113_s0 = inlined_call_operand.vmem [shape: f32[40,80], index: 0, kind: input, shape index: {}]   ;;  %s1114_s2 = inlined_call_operand.vmem [shape: f32[1,256], index: 2, kind: input, shape index: {}]   ;;  %s1115_s3 = inlined_call_operand.vmem [shape: f32[40,256], index: 3, kind: output, shape index: {}]  }
   0x1   :  { %v747_v0 = vld [vmem:[%s1112_s1 + $0x4] ss:$8 sps:$4 sm:$0xff]   ;;  %566 = vmatprep.mubr.bf16.mxu0 %v828_v1  ;;  %15 = vst [vmem:[#allocation2] sm:$0xff] %v828_v1  ;;  %16 = vst [vmem:[#allocation2 + $0x8] sm:$0xf] %v828_v1  ;;  %v27_v49 = vld [vmem:[%s1113_s0 + $0x10] sm:$0xff] }
   0x2   :  { %17 = vst [vmem:[#allocation2 + $0xc] sm:$0xff] %v828_v1  ;;  %18 = vst [vmem:[#allocation2 + $0x14] sm:$0xf] %v828_v1  ;;  %v749_v2 = vld [vmem:[%s1112_s1] ss:$8 sps:$4 sm:$0xff]   ;;  %473 = vmatprep.subr.bf16.mxu1 %v747_v0  ;;  %v28_v50 = vld [vmem:[%s1113_s0 + $0x18] sm:$0xff]  ;;  %v713_v52 = vpack.c.bf16 %v27_v49, %v27_v49 }
   0x3   :  { %19 = vst [vmem:[#allocation2 + $0x18] sm:$0xff] %v828_v1  ;;  %20 = vst [vmem:[#allocation2 + $0x20] sm:$0xf] %v828_v1  ;;  %v750_v3 = vld [vmem:[%s1112_s1 + $0x14] ss:$8 sps:$4 sm:$0xff]   ;;  %474 = vmatpush1.bf16.msra.mxu1 %v749_v2  ;;  %v25_v34 = vld [vmem:[%s1113_s0] sm:$0xff]  ;;  %v714_v53 = vpack.c.bf16 %v28_v50, %v28_v50 }
   0x4   :  { %21 = vst [vmem:[#allocation2 + $0x24] sm:$0xff] %v828_v1  ;;  %22 = vst [vmem:[#allocation2 + $0x2c] sm:$0xf] %v828_v1  ;;  %v752_v4 = vld [vmem:[%s1112_s1 + $0x10] ss:$8 sps:$4 sm:$0xff]   ;;  %475 = vmatprep.subr.bf16.mxu1 %v750_v3  ;;  %v26_v35 = vld [vmem:[%s1113_s0 + $0x8] sm:$0xff]  ;;  %v711_v39 = vpack.c.bf16 %v25_v34, %v25_v34 }
   0x5   :  { %23 = vst [vmem:[#allocation2 + $0x30] sm:$0xff] %v828_v1  ;;  %24 = vst [vmem:[#allocation2 + $0x38] sm:$0xf] %v828_v1  ;;  %v753_v5 = vld [vmem:[%s1112_s1 + $0x24] ss:$8 sps:$4 sm:$0xff]   ;;  %v712_v40 = vpack.c.bf16 %v26_v35, %v26_v35  ;;  %v60_v51 = vld [vmem:[%s1113_s0 + $0x11] sm:$0xff] }
   0x6   :  { %v755_v6 = vld [vmem:[%s1112_s1 + $0x20] ss:$8 sps:$4 sm:$0xff]   ;;  %v756_v7 = vld [vmem:[%s1112_s1 + $0x34] ss:$8 sps:$4 sm:$0xff]   ;;  %v758_v8 = vld [vmem:[%s1112_s1 + $0x30] ss:$8 sps:$4 sm:$0xff]   ;;  %v718_v55 = vpack.c.bf16 %v60_v51, %v60_v51 }
   0x7   :  { %476 = vmatpush1.bf16.msra.mxu1 %v752_v4  ;;  %v771_v9 = vld [vmem:[%s1112_s1 + $0x104] ss:$8 sps:$4 sm:$0xff]   ;;  %v775_v11 = vld [vmem:[%s1112_s1 + $0x100] ss:$8 sps:$4 sm:$0xff]   ;;  %v777_v12 = vld [vmem:[%s1112_s1 + $0x114] ss:$8 sps:$4 sm:$0xff]  }
   0x8   :  { %477 = vmatprep.subr.bf16.mxu1 %v753_v5  ;;  %v759_v10 = vld [vmem:[%s1112_s1 + $0x44] ss:$8 sps:$4 sm:$0xff]   ;;  %534 = vmatprep.subr.bf16.mxu0 %v771_v9  ;;  %v761_v13 = vld [vmem:[%s1112_s1 + $0x40] ss:$8 sps:$4 sm:$0xff]   ;;  %v762_v14 = vld [vmem:[%s1112_s1 + $0x54] ss:$8 sps:$4 sm:$0xff]  }
   0x9   :  { %535 = vmatpush1.bf16.msra.mxu0 %v775_v11  ;;  %v781_v15 = vld [vmem:[%s1112_s1 + $0x110] ss:$8 sps:$4 sm:$0xff]   ;;  %v783_v16 = vld [vmem:[%s1112_s1 + $0x124] ss:$8 sps:$4 sm:$0xff]   ;;  %v787_v18 = vld [vmem:[%s1112_s1 + $0x120] ss:$8 sps:$4 sm:$0xff]  }
   0xa   :  { %536 = vmatprep.subr.bf16.mxu0 %v777_v12  ;;  %v764_v17 = vld [vmem:[%s1112_s1 + $0x50] ss:$8 sps:$4 sm:$0xff]   ;;  %v789_v19 = vld [vmem:[%s1112_s1 + $0x134] ss:$8 sps:$4 sm:$0xff]   ;;  %v765_v20 = vld [vmem:[%s1112_s1 + $0x64] ss:$8 sps:$4 sm:$0xff]  }
   0xb   :  { %478 = vmatpush1.bf16.msra.mxu1 %v755_v6  ;;  %v793_v21 = vld [vmem:[%s1112_s1 + $0x130] ss:$8 sps:$4 sm:$0xff]   ;;  %v767_v22 = vld [vmem:[%s1112_s1 + $0x60] ss:$8 sps:$4 sm:$0xff]   ;;  %v795_v23 = vld [vmem:[%s1112_s1 + $0x144] ss:$8 sps:$4 sm:$0xff]  }
   0xc   :  { %479 = vmatprep.subr.bf16.mxu1 %v756_v7  ;;  %v768_v24 = vld [vmem:[%s1112_s1 + $0x74] ss:$8 sps:$4 sm:$0xff]   ;;  %v770_v25 = vld [vmem:[%s1112_s1 + $0x70] ss:$8 sps:$4 sm:$0xff]   ;;  %v799_v26 = vld [vmem:[%s1112_s1 + $0x140] ss:$8 sps:$4 sm:$0xff]  }
   0xd   :  { %537 = vmatpush1.bf16.msra.mxu0 %v781_v15  ;;  %v801_v27 = vld [vmem:[%s1112_s1 + $0x154] ss:$8 sps:$4 sm:$0xff]   ;;  %v773_v28 = vld [vmem:[%s1112_s1 + $0x84] ss:$8 sps:$4 sm:$0xff]   ;;  %v805_v29 = vld [vmem:[%s1112_s1 + $0x150] ss:$8 sps:$4 sm:$0xff]  }
   0xe   :  { %538 = vmatprep.subr.bf16.mxu0 %v783_v16  ;;  %v776_v30 = vld [vmem:[%s1112_s1 + $0x80] ss:$8 sps:$4 sm:$0xff]   ;;  %v779_v31 = vld [vmem:[%s1112_s1 + $0x94] ss:$8 sps:$4 sm:$0xff]   ;;  %v807_v32 = vld [vmem:[%s1112_s1 + $0x164] ss:$8 sps:$4 sm:$0xff]  }
   0xf   :  { %480 = vmatpush1.bf16.msra.mxu1 %v758_v8  ;;  %v811_v33 = vld [vmem:[%s1112_s1 + $0x160] ss:$8 sps:$4 sm:$0xff]   ;;  %v782_v37 = vld [vmem:[%s1112_s1 + $0x90] ss:$8 sps:$4 sm:$0xff]   ;;  %v813_v38 = vld [vmem:[%s1112_s1 + $0x174] ss:$8 sps:$4 sm:$0xff]  }
  0x10   :  { %481 = vmatprep.subr.bf16.mxu1 %v759_v10  ;;  %v58_v36 = vld [vmem:[%s1113_s0 + $0x1] sm:$0xff]  ;;  %v59_v41 = vld [vmem:[%s1113_s0 + $0x9] sm:$0xff]  ;;  %52 = vst.msk [vmem:[#allocation2] sm:$0xf] %vm51_vm0, %v711_v39  ;;  %53 = vst.msk [vmem:[#allocation2 + $0xc] sm:$0xf] %vm51_vm0, %v712_v40 }
  0x11   :  { %539 = vmatpush1.bf16.msra.mxu0 %v787_v18  ;;  %v716_v42 = vpack.c.bf16 %v58_v36, %v58_v36  ;;  %v89_v43 = vld [vmem:[%s1113_s0 + $0x2] sm:$0xff]  ;;  %v90_v44 = vld [vmem:[%s1113_s0 + $0xa] sm:$0xff]  ;;  %v717_v46 = vpack.c.bf16 %v59_v41, %v59_v41  ;;  %v61_v54 = vld [vmem:[%s1113_s0 + $0x19] sm:$0xff]  ;;  %54 = vst.msk [vmem:[#allocation2 + $0x18] sm:$0xf] %vm51_vm0, %v713_v52 }
  0x12   :  { %540 = vmatprep.subr.bf16.mxu0 %v789_v19  ;;  %v785_v45 = vld [vmem:[%s1112_s1 + $0xa4] ss:$8 sps:$4 sm:$0xff]   ;;  %v721_v47 = vpack.c.bf16 %v89_v43, %v89_v43  ;;  %v722_v48 = vpack.c.bf16 %v90_v44, %v90_v44  ;;  %v91_v56 = vld [vmem:[%s1113_s0 + $0x12] sm:$0xff]  ;;  %v92_v57 = vld [vmem:[%s1113_s0 + $0x1a] sm:$0xff]  ;;  %v719_v58 = vpack.c.bf16 %v61_v54, %v61_v54  ;;  %55 = vst.msk [vmem:[#allocation2 + $0x24] sm:$0xf] %vm51_vm0, %v714_v53 }
  0x13   :  { %482 = vmatpush1.bf16.msra.mxu1 %v761_v13  ;;  %84 = vst.msk [vmem:[#allocation2 + $0x4] sm:$0xf] %vm51_vm0, %v716_v42  ;;  %85 = vst.msk [vmem:[#allocation2 + $0x10] sm:$0xf] %vm51_vm0, %v717_v46  ;;  %v723_v59 = vpack.c.bf16 %v91_v56, %v91_v56  ;;  %v724_v60 = vpack.c.bf16 %v92_v57, %v92_v57  ;;  %v29_v61 = vld [vmem:[%s1113_s0 + $0x20] sm:$0x3f] }
  0x14   :  { %483 = vmatprep.subr.bf16.mxu1 %v762_v14  ;;  %115 = vst.msk [vmem:[#allocation2 + $0x8] sm:$0xf] %vm51_vm0, %v721_v47  ;;  %116 = vst.msk [vmem:[#allocation2 + $0x14] sm:$0xf] %vm51_vm0, %v722_v48  ;;  %v62_v62 = vld [vmem:[%s1113_s0 + $0x21] sm:$0x3f]  ;;  %v715_v0 = vpack.c.bf16 %v29_v61, %v29_v61 }
  0x15   :  { %541 = vmatpush1.bf16.msra.mxu0 %v793_v21  ;;  %v93_v63 = vld [vmem:[%s1113_s0 + $0x22] sm:$0x3f]  ;;  %86 = vst.msk [vmem:[#allocation2 + $0x1c] sm:$0xf] %vm51_vm0, %v718_v55  ;;  %v720_v2 = vpack.c.bf16 %v62_v62, %v62_v62  ;;  %v817_v4 = vld [vmem:[%s1112_s1 + $0x170] ss:$8 sps:$4 sm:$0xff]  }
  0x16   :  { %542 = vmatprep.subr.bf16.mxu0 %v795_v23  ;;  %v725_v3 = vpack.c.bf16 %v93_v63, %v93_v63  ;;  %87 = vst.msk [vmem:[#allocation2 + $0x28] sm:$0xf] %vm51_vm0, %v719_v58  ;;  %117 = vst.msk [vmem:[#allocation2 + $0x20] sm:$0xf] %vm51_vm0, %v723_v59  ;;  %v788_v5 = vld [vmem:[%s1112_s1 + $0xa0] ss:$8 sps:$4 sm:$0xff]  }
  0x17   :  { %484 = vmatpush1.bf16.msra.mxu1 %v764_v17  ;;  %118 = vst.msk [vmem:[#allocation2 + $0x2c] sm:$0xf] %vm51_vm0, %v724_v60  ;;  %v791_v6 = vld [vmem:[%s1112_s1 + $0xb4] ss:$8 sps:$4 sm:$0xff]   ;;  %v794_v7 = vld [vmem:[%s1112_s1 + $0xb0] ss:$8 sps:$4 sm:$0xff]  }
  0x18   :  { %485 = vmatprep.subr.bf16.mxu1 %v765_v20  ;;  %57 = vst.msk [vmem:[#allocation2 + $0x30] sm:$0x7] %vm56_vm1, %v715_v0  ;;  %88 = vst.msk [vmem:[#allocation2 + $0x34] sm:$0x7] %vm56_vm1, %v720_v2  ;;  %v797_v8 = vld [vmem:[%s1112_s1 + $0xc4] ss:$8 sps:$4 sm:$0xff]  }
  0x19   :  { %543 = vmatpush1.bf16.msra.mxu0 %v799_v26  ;;  %119 = vst.msk [vmem:[#allocation2 + $0x38] sm:$0x7] %vm56_vm1, %v725_v3  ;;  %v800_v11 = vld [vmem:[%s1112_s1 + $0xc0] ss:$8 sps:$4 sm:$0xff]   ;;  %v803_v12 = vld [vmem:[%s1112_s1 + $0xd4] ss:$8 sps:$4 sm:$0xff]  }
  0x1a   :  { %544 = vmatprep.subr.bf16.mxu0 %v801_v27  ;;  %v821_v9 = vld [vmem:[#allocation2 + $0x4] ss:$12 sps:$4 sm:$0xff]   ;;  %v812_v16 = vld [vmem:[%s1112_s1 + $0xe0] ss:$8 sps:$4 sm:$0xff]   ;;  %v815_v17 = vld [vmem:[%s1112_s1 + $0xf4] ss:$8 sps:$4 sm:$0xff]  }
  0x1b   :  { %486 = vmatpush1.bf16.msra.mxu1 %v767_v22  ;;  %v822_v10 = vld [vmem:[#allocation2 + $0x8] ss:$12 sps:$4 sm:$0xff]   ;;  %505 = vmatprep.mubr.bf16.mxu1 %v821_v9  ;;  %v806_v14 = vld [vmem:[%s1112_s1 + $0xd0] ss:$8 sps:$4 sm:$0xff]   ;;  %v809_v15 = vld [vmem:[%s1112_s1 + $0xe4] ss:$8 sps:$4 sm:$0xff]  }
  0x1c   :  { %487 = vmatprep.subr.bf16.mxu1 %v768_v24  ;;  %v818_v19 = vld [vmem:[%s1112_s1 + $0xf0] ss:$8 sps:$4 sm:$0xff]   ;;  %v819_v20 = vld [vmem:[#allocation2] ss:$12 sps:$4 sm:$0xff]  }
  0x1d   :  { %545 = vmatpush1.bf16.msra.mxu0 %v805_v29  ;;  %v823_v21 = vld [vmem:[#allocation2 + $0x1c] ss:$12 sps:$4 sm:$0xff]  }
  0x1e   :  { %546 = vmatprep.subr.bf16.mxu0 %v807_v32  ;;  %v825_v13 = vld [vmem:[#allocation2 + $0x20] ss:$12 sps:$4 sm:$0xff]   ;;  %v124_v22 = vld [vmem:[#allocation2 + $0x18] sm:$0xff]  ;;  %v126_v23 = vld [vmem:[#allocation2 + $0x24] sm:$0xff] }
  0x1f   :  { %488 = vmatpush1.bf16.msra.mxu1 %v770_v25  ;;  %v657_v24 = vcombine.low %v124_v22, %v126_v23 }
  0x20   :  { %489 = vmatprep.subr.bf16.mxu1 %v773_v28  ;;  %v827_v18 = vld [vmem:[#allocation2 + $0x38] ss:$0 sps:$4 sm:$0xff]  }
  0x21   :  { %547 = vmatpush1.bf16.msra.mxu0 %v811_v33 }
  0x22   :  { %548 = vmatprep.subr.bf16.mxu0 %v813_v38  ;;  %v178_v38 = vld [vmem:[%s1114_s2] sm:$0x3] }
  0x23   :  { %490 = vmatpush1.bf16.msra.mxu1 %v776_v30 }
  0x24   :  { %491 = vmatprep.subr.bf16.mxu1 %v779_v31  ;;  %v180_v31 = vlaneseq }
  0x25   :  { %549 = vmatpush1.bf16.msra.mxu0 %v817_v4 }
  0x26   :  { %v181_v33 = vshrl.u32 %v180_v31, 7 }
  0x27   :  { %492 = vmatpush1.bf16.msra.mxu1 %v782_v37 }
  0x28   :  { %493 = vmatprep.subr.bf16.mxu1 %v785_v45  ;;  %567 = vmatmul.mubr.bf16.vlgmr.msra.gmra.mrb[0].mxu0 %v822_v10  ;;  %v182_v37 = vsub.s32 0, %v181_v33  ;;  %v186_v39 = vsub.s32 1, %v181_v33 }
  0x29   :  { %576 = vmatprep.mubr.bf16.mxu0 %v828_v1 }
  0x2a   :  { %v183_v41 = vrot.slane %v178_v38, %v182_v37  ;;  %v1073_v43 = vrot.slane %v178_v38, %v186_v39 }
  0x2b   :  { %494 = vmatpush1.bf16.msra.mxu1 %v788_v5 }
  0x2c   :  { %495 = vmatprep.subr.bf16.mxu1 %v791_v6 }
  0x2f   :  { %496 = vmatpush1.bf16.msra.mxu1 %v794_v7 }
  0x30   :  { %497 = vmatprep.subr.bf16.mxu1 %v797_v8  ;;  %577 = vmatmul.mubr.bf16.gmra.mrb[4].mxu0 %v825_v13 }
  0x31   :  { %586 = vmatprep.mubr.bf16.mxu0 %v828_v1  ;;  %v128_v1 = vld [vmem:[#allocation2 + $0x30] sm:$0xff] }
  0x32   :  { %v661_v25 = vcombine.high %v128_v1, %v128_v1  ;;  %v660_v26 = vcombine.low %v128_v1, %v128_v1 }
  0x33   :  { %498 = vmatpush1.bf16.msra.mxu1 %v800_v11 }
  0x34   :  { %499 = vmatprep.subr.bf16.mxu1 %v803_v12 }
  0x37   :  { %500 = vmatpush1.bf16.msra.mxu1 %v806_v14 }
  0x38   :  { %501 = vmatprep.subr.bf16.mxu1 %v809_v15  ;;  %587 = vmatmul.mubr.bf16.gmra.mrb[8].mxu0 %v827_v18 }
  0x3b   :  { %502 = vmatpush1.bf16.msra.mxu1 %v812_v16 }
  0x3c   :  { %503 = vmatprep.subr.bf16.mxu1 %v815_v17 }
  0x3f   :  { %504 = vmatpush1.bf16.msra.mxu1 %v818_v19 }
  0x42   :  { %506 = vmatmul.mubr.bf16.vlgmr.msra.gmra.mrb[0].mxu1 %v819_v20 }
  0x43   :  { %515 = vmatprep.mubr.bf16.mxu1 %v823_v21 }
  0x4a   :  { %516 = vmatmul.mubr.bf16.gmra.mrb[4].mxu1 %v657_v24 }
  0x4b   :  { %525 = vmatprep.mubr.bf16.mxu1 %v661_v25 }
  0x52   :  { %526 = vmatmul.mubr.bf16.gmra.mrb[8].mxu1 %v660_v26 }
  0xfb   :  { %v568_v27 = vpop.f32.mrb[0].mxu0 }
  0xfc   :  { %v570_v28 = vpop.f32.mrb[1].mxu0 }
  0xfd   :  { %v572_v29 = vpop.f32.mrb[2].mxu0 }
  0xfe   :  { %v574_v30 = vpop.f32.mrb[3].mxu0 }
 0x103   :  { %v578_v32 = vpop.f32.mrb[4].mxu0 }
 0x104   :  { %v580_v34 = vpop.f32.mrb[5].mxu0 }
 0x105   :  { %v582_v35 = vpop.f32.mrb[6].mxu0 }
 0x106   :  { %v584_v36 = vpop.f32.mrb[7].mxu0 }
 0x10b   :  { %v1069_v40 = vpop.f32.mrb[8].mxu0 }
 0x10c   :  { %v1071_v42 = vpop.f32.mrb[9].mxu0 }
 0x10d   :  { %v592_v44 = vpop.f32.mrb[10].mxu0 }
 0x10e   :  { %v593_v45 = vpop.f32.mrb[11].mxu0 }
 0x115   :  { %v507_v46 = vpop.f32.mrb[0].mxu1 }
 0x116   :  { %v508_v47 = vadd.f32 %v507_v46, %v183_v41  ;;  %v509_v48 = vpop.f32.mrb[1].mxu1 }
 0x117   :  { %v510_v49 = vadd.f32 %v509_v48, %v1073_v43  ;;  %v511_v50 = vpop.f32.mrb[2].mxu1 }
 0x118   :  { %v569_v51 = vadd.f32 %v568_v27, %v508_v47  ;;  %v512_v52 = vadd.f32 %v511_v50, %v183_v41  ;;  %v513_v53 = vpop.f32.mrb[3].mxu1 }
 0x119   :  { %v571_v54 = vadd.f32 %v570_v28, %v510_v49  ;;  %v514_v55 = vadd.f32 %v513_v53, %v1073_v43 }
 0x11a   :  { %vm595_vm2 = vcmp.gt.f32.partialorder %v569_v51, 0.0  ;;  %v605_v56 = vmul.f32 0.01, %v569_v51  ;;  %v573_v57 = vadd.f32 %v572_v29, %v512_v52 }
 0x11b   :  { %vm596_vm3 = vcmp.gt.f32.partialorder %v571_v54, 0.0  ;;  %v606_v58 = vmul.f32 0.01, %v571_v54  ;;  %v575_v59 = vadd.f32 %v574_v30, %v514_v55 }
 0x11c   :  { %v615_v60 = vsel %vm595_vm2, %v569_v51, %v605_v56  ;;  %vm597_vm4 = vcmp.gt.f32.partialorder %v573_v57, 0.0  ;;  %v607_v61 = vmul.f32 0.01, %v573_v57 }
 0x11d   :  { %625 = vst [vmem:[%s1115_s3] sm:$0xff] %v615_v60  ;;  %v616_v62 = vsel %vm596_vm3, %v571_v54, %v606_v58  ;;  %vm598_vm5 = vcmp.gt.f32.partialorder %v575_v59, 0.0  ;;  %v608_v63 = vmul.f32 0.01, %v575_v59  ;;  %v517_v0 = vpop.f32.mrb[4].mxu1 }
 0x11e   :  { %626 = vst [vmem:[%s1115_s3 + $0x8] sm:$0xff] %v616_v62  ;;  %v617_v2 = vsel %vm597_vm4, %v573_v57, %v607_v61  ;;  %v518_v3 = vadd.f32 %v517_v0, %v183_v41  ;;  %v519_v4 = vpop.f32.mrb[5].mxu1 }
 0x11f   :  { %627 = vst [vmem:[%s1115_s3 + $0x10] sm:$0xff] %v617_v2  ;;  %v618_v5 = vsel %vm598_vm5, %v575_v59, %v608_v63  ;;  %v520_v6 = vadd.f32 %v519_v4, %v1073_v43  ;;  %v521_v7 = vpop.f32.mrb[6].mxu1 }
 0x120   :  { %628 = vst [vmem:[%s1115_s3 + $0x18] sm:$0xff] %v618_v5  ;;  %v579_v8 = vadd.f32 %v578_v32, %v518_v3  ;;  %v522_v9 = vadd.f32 %v521_v7, %v183_v41  ;;  %v523_v10 = vpop.f32.mrb[7].mxu1 }
 0x121   :  { %v581_v11 = vadd.f32 %v580_v34, %v520_v6  ;;  %v524_v12 = vadd.f32 %v523_v10, %v1073_v43 }
 0x122   :  { %vm599_vm6 = vcmp.gt.f32.partialorder %v579_v8, 0.0  ;;  %v609_v13 = vmul.f32 0.01, %v579_v8  ;;  %v583_v14 = vadd.f32 %v582_v35, %v522_v9 }
 0x123   :  { %vm600_vm7 = vcmp.gt.f32.partialorder %v581_v11, 0.0  ;;  %v610_v15 = vmul.f32 0.01, %v581_v11  ;;  %v585_v16 = vadd.f32 %v584_v36, %v524_v12 }
 0x124   :  { %v619_v17 = vsel %vm599_vm6, %v579_v8, %v609_v13  ;;  %vm601_vm8 = vcmp.gt.f32.partialorder %v583_v14, 0.0  ;;  %v611_v18 = vmul.f32 0.01, %v583_v14 }
 0x125   :  { %629 = vst [vmem:[%s1115_s3 + $0x20] sm:$0xff] %v619_v17  ;;  %v620_v19 = vsel %vm600_vm7, %v581_v11, %v610_v15  ;;  %vm602_vm9 = vcmp.gt.f32.partialorder %v585_v16, 0.0  ;;  %v612_v20 = vmul.f32 0.01, %v585_v16  ;;  %v527_v21 = vpop.f32.mrb[8].mxu1 }
 0x126   :  { %630 = vst [vmem:[%s1115_s3 + $0x28] sm:$0xff] %v620_v19  ;;  %v621_v22 = vsel %vm601_vm8, %v583_v14, %v611_v18  ;;  %v528_v23 = vadd.f32 %v527_v21, %v183_v41  ;;  %v529_v1 = vpop.f32.mrb[9].mxu1 }
 0x127   :  { %631 = vst [vmem:[%s1115_s3 + $0x30] sm:$0xff] %v621_v22  ;;  %v622_v24 = vsel %vm602_vm9, %v585_v16, %v612_v20  ;;  %v530_v25 = vadd.f32 %v529_v1, %v1073_v43  ;;  %v531_v26 = vpop.f32.mrb[10].mxu1 }
 0x128   :  { %632 = vst [vmem:[%s1115_s3 + $0x38] sm:$0xff] %v622_v24  ;;  %v589_v27 = vadd.f32 %v1069_v40, %v528_v23  ;;  %v532_v28 = vpop.f32.mrb[11].mxu1 }
 0x129   :  { %v591_v29 = vadd.f32 %v1071_v42, %v530_v25 }
 0x12a   :  { %vm603_vm10 = vcmp.gt.f32.partialorder %v589_v27, 0.0  ;;  %v613_v30 = vmul.f32 0.01, %v589_v27 }
 0x12b   :  { %vm604_vm11 = vcmp.gt.f32.partialorder %v591_v29, 0.0  ;;  %v614_v31 = vmul.f32 0.01, %v591_v29 }
 0x12c   :  { %v623_v32 = vsel %vm603_vm10, %v589_v27, %v613_v30 }
 0x12d   :  { %633 = vst [vmem:[%s1115_s3 + $0x40] sm:$0xff] %v623_v32  ;;  %v624_v33 = vsel %vm604_vm11, %v591_v29, %v614_v31 }
 0x12e   :  { %634 = vst [vmem:[%s1115_s3 + $0x48] sm:$0xff] %v624_v33 }

</bundles_post_ra>
